<compile_context>
chip_gen: v7x
topology: tpu7x:2x2x1
jax: 0.10.0
libtpu: 0.0.40
codegen_flags: <defaults>
</compile_context>

<pallas_src>
import jax
import jax.numpy as jnp
from jax.experimental import pallas as pl
from jax.experimental.pallas import tpu as pltpu


def _round_up(x, m):
    return (x + m - 1) // m * m


def _target_lane_width():
    """256-lane packing on v6e/v7x (2x256^2 MXU), 128 on v5e/v5p (128-wide MXU)."""
    try:
        kind = jax.devices()[0].device_kind.lower()
    except Exception:
        return 128
    if "v6" in kind or "v7" in kind:
        return 256
    return 128


def _fused_proj_kernel(x_ref, w_ref, b_ref, o_ref):
    # x_ref: (TM, GD) f32 packed rows of `value`; cast to bf16 on the VPU here so
    #        the HBM->VMEM DMA is a single f32 read (no wrapper cast pass).
    # w_ref: (GD, GD) bf16 block-diagonal expansion of W_fused = Wv @ Wo
    #        (stored (in, out), i.e. already transposed vs. torch Linear.weight).
    # b_ref: (1, GD)  f32 tiled fused bias b_fused = bv @ Wo + bo.
    x = x_ref[...].astype(jnp.bfloat16)
    out = jnp.dot(x, w_ref[...], preferred_element_type=jnp.float32) + b_ref[...]
    o_ref[...] = out.astype(o_ref.dtype)


def extended_self_attention(query, key, value, params, mask=None,
                            out_dtype=jnp.bfloat16):
    """Pallas forward of ExtendedSelfAttention (n_heads == 1, mask=None path).

    query/key/value: (B, S, D) float arrays.  Only `value` feeds the kernel:
    with n_heads == 1 the softmax over the size-1 head axis is identically 1,
    so the q/k projections and score/softmax path have no effect on the output
    (dead compute removed).  Output dtype defaults to bf16 (HBM-write saving);
    pass out_dtype=jnp.float32 for a full-precision store.
    """
    if mask is not None:
        # TODO(synk): mask (scores masking) is not plumbed into the kernel.
        raise NotImplementedError("mask is not supported (mask=None path only).")
    del query, key

    B, S, D = value.shape
    wv = params["wv"].astype(jnp.float32)                 # (D, D), (in, out) layout
    wo = params["wo"].astype(jnp.float32)                 # (D, D)
    bv = params["bv"].reshape(1, D).astype(jnp.float32)   # accepts (D,) or (1, D)
    bo = params["bo"].reshape(1, D).astype(jnp.float32)

    # ---- Projection fusion: out = (v @ Wv + bv) @ Wo + bo = v @ (Wv@Wo) + (bv@Wo + bo).
    hi = jax.lax.Precision.HIGHEST
    w_fused = jnp.dot(wv, wo, precision=hi)               # (D, D) f32
    b_fused = jnp.dot(bv, wo, precision=hi) + bo          # (1, D) f32

    # ---- Lane packing: pack G rows per 128/256-lane slab (block-diagonal weight
    # expansion).  Extra block-diagonal zeros are free: the kernel is HBM-bound.
    lane_target = _target_lane_width()
    M = B * S
    if D < lane_target and lane_target % D == 0:
        G = lane_target // D
    else:
        G = 1                    # D >= lane width (or doesn't divide it): no packing
    GD = G * D

    # Pad M up to a multiple of G (never fall back to sub-128-lane masked stores).
    Mg = _round_up(M, G)
    x = value.reshape(M, D).astype(jnp.float32)
    if Mg != M:
        x = jnp.pad(x, ((0, Mg - M), (0, 0)))
    Mp = Mg // G
    x = x.reshape(Mp, GD)

    # ---- VMEM accounting + row-tile selection.
    out_itemsize = jnp.dtype(out_dtype).itemsize
    w_block_bytes = GD * GD * 2                            # bf16 fused weight block
    big_weight = w_block_bytes > (2 << 20)
    w_bufs = 1 if big_weight else 2                        # Buffered(1) when large
    resident_bytes = w_block_bytes * w_bufs + 2 * (GD * 4)  # + double-buffered bias
    row_stream_bytes = 2 * (GD * 4) + 2 * (GD * out_itemsize)  # db x-tile + db out-tile

    # HBM-bound => as-large-as-fits row tiles (up to 1024 rows), but keep >= 2
    # tiles when there is enough work so both v7x TensorCores stay busy, and
    # stay well inside v7x's 64 MiB physical VMEM.
    vmem_budget = 40 << 20
    tm_cap = max(8, (vmem_budget - resident_bytes) // row_stream_bytes)
    TM = max(8, min(1024, (tm_cap // 8) * 8))
    if Mp > 8:
        TM = min(TM, _round_up(-(-Mp // 2), 8))            # >= 2 tiles for 2 TCs
    TM = max(8, min(TM, _round_up(Mp, 8)))

    Mp_pad = _round_up(Mp, TM)
    if Mp_pad != Mp:
        x = jnp.pad(x, ((0, Mp_pad - Mp), (0, 0)))
    n_tiles = Mp_pad // TM

    # Block-diagonal expansion: packed_row @ blockdiag(W_fused,...) computes the
    # G independent row @ W_fused products in one lane-dense (GD x GD) MXU matmul.
    w_bd = jnp.kron(jnp.eye(G, dtype=jnp.float32), w_fused).astype(jnp.bfloat16)
    b_t = jnp.tile(b_fused, (1, G))                        # (1, GD) f32

    flops = 2 * Mp_pad * GD * GD
    bytes_accessed = (Mp_pad * GD * 4 + w_bd.size * 2 + b_t.size * 4
                      + Mp_pad * GD * out_itemsize)

    row_in_spec = pl.BlockSpec((TM, GD), lambda i: (i, 0))
    row_out_spec = pl.BlockSpec((TM, GD), lambda i: (i, 0))
    if big_weight:
        # Constant-index weight block: Pallas never re-DMAs it, so single-buffer
        # it to avoid doubling a multi-MiB VMEM footprint (G=1, large-D case).
        # TODO(synk): for D so large the weight block itself exceeds VMEM, add a
        # K/N tiling grid axis for the fused weight instead of one (GD, GD) block.
        w_spec = pl.BlockSpec((GD, GD), lambda i: (0, 0),
                              pipeline_mode=pl.Buffered(1))
    else:
        w_spec = pl.BlockSpec((GD, GD), lambda i: (0, 0))
    b_spec = pl.BlockSpec((1, GD), lambda i: (0, 0))

    vmem_needed = resident_bytes + TM * row_stream_bytes + (2 << 20)
    vmem_limit = int(min(max(vmem_needed, 32 << 20), 56 << 20))

    out_packed = pl.pallas_call(
        _fused_proj_kernel,
        out_shape=jax.ShapeDtypeStruct((Mp_pad, GD), out_dtype),
        grid_spec=pl.GridSpec(
            grid=(n_tiles,),
            in_specs=[row_in_spec, w_spec, b_spec],
            out_specs=row_out_spec,
        ),
        compiler_params=pltpu.CompilerParams(
            dimension_semantics=("parallel",),
            vmem_limit_bytes=vmem_limit),
        cost_estimate=pl.CostEstimate(
            flops=flops, transcendentals=0, bytes_accessed=bytes_accessed),
    )(x, w_bd, b_t)

    # Strip row-tile padding, unpack lanes, strip M padding.
    out = out_packed[:Mp].reshape(Mg, D)[:M].reshape(B, S, D)
    return out


def _reference(query, key, value, params):
    """Pure-f32 JAX mirror of the PyTorch forward (n_heads == 1), including the
    (mathematically identity) score/softmax path."""
    D = query.shape[-1]
    hi = jax.lax.Precision.HIGHEST
    q = jnp.dot(query, params["wq"], precision=hi) + params["bq"].reshape(1, D)
    k = jnp.dot(key, params["wk"], precision=hi) + params["bk"].reshape(1, D)
    v = jnp.dot(value, params["wv"], precision=hi) + params["bv"].reshape(1, D)
    scores = jnp.einsum("bsd,bsd->bs", q, k, precision=hi)[..., None, None]
    scores = scores / jnp.sqrt(jnp.float32(D))
    weights = jax.nn.softmax(scores, axis=-1)          # (B, S, 1, 1) -> all ones
    context = weights[..., 0] * v                      # (B, S, D)
    return jnp.dot(context, params["wo"], precision=hi) + params["bo"].reshape(1, D)


if __name__ == "__main__":
    B, S, D = 2, 16, 32          # batch, seq, d_model
    n_heads = 1                  # only config for which the torch .view() is valid

    key0 = jax.random.PRNGKey(0)
    ks = jax.random.split(key0, 11)
    scale = 0.02
    params = {
        "wq": scale * jax.random.normal(ks[0], (D, D * n_heads), jnp.float32),
        "bq": scale * jax.random.normal(ks[1], (D * n_heads,), jnp.float32),
        "wk": scale * jax.random.normal(ks[2], (D, D * n_heads), jnp.float32),
        "bk": scale * jax.random.normal(ks[3], (D * n_heads,), jnp.float32),
        "wv": scale * jax.random.normal(ks[4], (D, D * n_heads), jnp.float32),
        "bv": scale * jax.random.normal(ks[5], (D * n_heads,), jnp.float32),
        "wo": scale * jax.random.normal(ks[6], (D * n_heads, D), jnp.float32),
        "bo": scale * jax.random.normal(ks[7], (D,), jnp.float32),
    }

    query = jax.random.normal(ks[8], (B, S, D), jnp.float32)
    key_in = jax.random.normal(ks[9], (B, S, D), jnp.float32)
    value = jax.random.normal(ks[10], (B, S, D), jnp.float32)

    out = extended_self_attention(query, key_in, value, params)
    out = jax.block_until_ready(out)
    assert out.shape == (B, S, D)

    ref = _reference(query, key_in, value, params)
    out_f32 = out.astype(jnp.float32)
    # Tolerance sized for bf16 MXU operands / fused bf16 weight / bf16 output
    # with f32 accumulation.
    max_err = float(jnp.max(jnp.abs(out_f32 - ref)))
    assert jnp.allclose(out_f32, ref, atol=5e-3, rtol=3e-2), \
        f"mismatch vs reference: {max_err}"

    print("KERNEL_OK")
</pallas_src>

<mosaic_0001>
module attributes {stable_mosaic.version = 11 : i64} {
  func.func @_fused_proj_kernel(%arg0: i32, %arg1: memref<8x128xf32, #tpu.memory_space<vmem>>, %arg2: memref<128x128xbf16, #tpu.memory_space<vmem>>, %arg3: memref<1x128xf32, #tpu.memory_space<vmem>>, %arg4: memref<8x128xbf16, #tpu.memory_space<vmem>>) attributes {dimension_semantics = [#tpu.dimension_semantics<parallel>], iteration_bounds = array<i64: 1>, scalar_prefetch = 0 : i64, scratch_operands = 0 : i64, tpu.core_type = #tpu.core_type<tc>, window_params = [{transform_indices = @transform_0, window_bounds = array<i64: 8, 128>}, {pipeline_mode = #tpu.pipeline_mode<synchronous>, transform_indices = @transform_1, window_bounds = array<i64: 128, 128>}, {pipeline_mode = #tpu.pipeline_mode<synchronous>, transform_indices = @transform_2, window_bounds = array<i64: 1, 128>}, {transform_indices = @transform_3, window_bounds = array<i64: 8, 128>}]} {
    %c0 = arith.constant 0 : index
    %c0_0 = arith.constant 0 : index
    %0 = vector.load %arg1[%c0, %c0_0] : memref<8x128xf32, #tpu.memory_space<vmem>>, vector<8x128xf32>
    %1 = arith.truncf %0 : vector<8x128xf32> to vector<8x128xbf16>
    %c0_1 = arith.constant 0 : index
    %c0_2 = arith.constant 0 : index
    %2 = vector.load %arg2[%c0_1, %c0_2] : memref<128x128xbf16, #tpu.memory_space<vmem>>, vector<128x128xbf16>
    %cst = arith.constant dense<0.000000e+00> : vector<8x128xf32>
    %3 = tpu.matmul %1, %2, %cst {dimension_numbers = #tpu.dot_dimension_numbers<[1], [0], [0], [1], [0, 0, 1, 1], [], []>} : vector<8x128xbf16>, vector<128x128xbf16>, vector<8x128xf32> -> vector<8x128xf32>
    %c0_3 = arith.constant 0 : index
    %c0_4 = arith.constant 0 : index
    %4 = vector.load %arg3[%c0_3, %c0_4] : memref<1x128xf32, #tpu.memory_space<vmem>>, vector<1x128xf32>
    %5 = vector.broadcast %4 : vector<1x128xf32> to vector<8x128xf32>
    %6 = arith.addf %3, %5 : vector<8x128xf32>
    %7 = arith.truncf %6 : vector<8x128xf32> to vector<8x128xbf16>
    %c0_5 = arith.constant 0 : index
    %c0_6 = arith.constant 0 : index
    %8 = vector.load %arg4[%c0_5, %c0_6] : memref<8x128xbf16, #tpu.memory_space<vmem>>, vector<8x128xbf16>
    tpu.vector_store %arg4[%c0_5, %c0_6], %7 {strides = array<i32>} : memref<8x128xbf16, #tpu.memory_space<vmem>>, vector<8x128xbf16>,
    return
  }
  func.func @transform_0(%arg0: i32) -> (i32, i32) {
    %c0_i32 = arith.constant 0 : i32
    %c0_i32_0 = arith.constant 0 : i32
    return %arg0, %c0_i32 : i32, i32
  }
  func.func @transform_1(%arg0: i32) -> (i32, i32) {
    %c0_i32 = arith.constant 0 : i32
    %c0_i32_0 = arith.constant 0 : i32
    %c0_i32_1 = arith.constant 0 : i32
    return %c0_i32, %c0_i32_0 : i32, i32
  }
  func.func @transform_2(%arg0: i32) -> (i32, i32) {
    %c0_i32 = arith.constant 0 : i32
    %c0_i32_0 = arith.constant 0 : i32
    %c0_i32_1 = arith.constant 0 : i32
    return %c0_i32, %c0_i32_0 : i32, i32
  }
  func.func @transform_3(%arg0: i32) -> (i32, i32) {
    %c0_i32 = arith.constant 0 : i32
    %c0_i32_0 = arith.constant 0 : i32
    return %arg0, %c0_i32 : i32, i32
  }
}

</mosaic_0001>

<bundles_post_ra>
// kernel: tpu_custom_call.1
= control target key start
LH: loop header
LB: loop body
LE: loop exit
PB: predicated region body
PF: predicated region fallthrough
CT: control target
= control target key end

     0   :  { %8 = vsyncpa [#allocation3], 0  ;;  %s371_s0 = inlined_call_operand.hbm [shape: f32[8,128], index: 0, kind: input, shape index: {}]   ;;  %s372_s1 = inlined_call_operand.hbm [shape: bf16[128,128], index: 1, kind: input, shape index: {}]   ;;  %s373_s2 = inlined_call_operand.vmem [shape: f32[1,128], index: 2, kind: input, shape index: {}]   ;;  %s374_s3 = inlined_call_operand.hbm [shape: bf16[8,128], index: 3, kind: output, shape index: {}]  }
   0x1   :  { %9 = vsyncpa [#allocation6], 0 }
   0x2   :  { %10 = vsyncpa [#allocation4], 0  ;;  %s298_s12 = smov [#allocation2]   ;;  %s299_s14 = smov [#allocation5]  }
   0x3   :  { %s17_s13 = sshll.u32 %s298_s12, 4  ;;  %s26_s15 = sshll.u32 %s299_s14, 4  ;;  %s18_s13 = int_to_ptr.vmem [resolvable:$true] %s17_s13  ;;  %s325_s15 = int_to_ptr.vmem [resolvable:$true] %s26_s15 }
   0x4   :  { %s226_s18 = scalar_lea.hbm %s371_s0, 128 }
   0x5   :  { %p227_p0 = scmp.ne.s32.totalorder %s371_s0, %s226_s18  ;;  %p230_p1 = scmp.lt.u32.totalorder %s226_s18, %s371_s0 }
   0x7   :  { %p232_p2 = pnand %p230_p1, %p227_p0 }
   0x9   :  { %235 = shalt.err (!%p232_p2)
}
   0xa   :  { %s236_s23 = scalar_lea.vmem %s18_s13, 128  ;;  %p241_p4 = scmp.lt.s32.totalorder %s18_s13, %s18_s13 }
   0xb   :  { %p237_p3 = scmp.ne.s32.totalorder %s18_s13, %s236_s23  ;;  %p242_p5 = scmp.lt.s32.totalorder %s236_s23, %s236_s23 }
   0xd   :  { %p243_p6 = por %p242_p5, %p241_p4 }
   0xf   :  { %p244_p7 = pnand %p243_p6, %p237_p3 }
  0x11   :  { %247 = shalt.err (!%p244_p7)
}
  0x12   :  { %20 = dma.hbm_to_vmem [thread:$0]  %s371_s0, 128, %s18_s13, [#allocation3]  }
  0x13   :  { %s248_s28 = scalar_lea.hbm %s372_s1, 1024 }
  0x14   :  { %p249_p8 = scmp.ne.s32.totalorder %s372_s1, %s248_s28  ;;  %p252_p9 = scmp.lt.u32.totalorder %s248_s28, %s372_s1 }
  0x16   :  { %p254_p10 = pnand %p252_p9, %p249_p8 }
  0x18   :  { %257 = shalt.err (!%p254_p10)
}
  0x19   :  { %s258_s6 = scalar_lea.vmem %s325_s15, 1024  ;;  %p263_p12 = scmp.lt.s32.totalorder %s325_s15, %s325_s15 }
  0x1a   :  { %p259_p11 = scmp.ne.s32.totalorder %s325_s15, %s258_s6  ;;  %p264_p13 = scmp.lt.s32.totalorder %s258_s6, %s258_s6 }
  0x1c   :  { %p265_p0 = por %p264_p13, %p263_p12 }
  0x1e   :  { %p266_p1 = pnand %p265_p0, %p259_p11 }
  0x20   :  { %269 = shalt.err (!%p266_p1)
}
  0x21   :  { %s300_s0 = smov 64   ;;  %s301_s7 = smov 4  }
  0x22   :  { %32 = dma.hbm_to_vmem [thread:$0]  %s372_s1, 1024, %s325_s15, [#allocation6], %s300_s0, %s300_s0, %s301_s7  }
  0x23   :  { %292 = dma.done.wait [#allocation3], 128  }
  0x24   :  { %293 = vsyncadd [#allocation3], 4294967168 }
  0x25   :  { %294 = dma.done.wait [#allocation6], 1024  }
  0x26   :  { %295 = vsyncadd [#allocation6], 4294966272  ;;  %v302_v0 = vmov 0.0   ;;  %vm303_vm0 = vmmov 0   ;;  %v218_v1 = vld [vmem:[#allocation5] sm:$0xff]   ;;  %v219_v2 = vld [vmem:[#allocation5 + $0x8] sm:$0xff]  }
  0x27   :  { %191 = vmatprep.subr.bf16.mxu0 %v302_v0  ;;  %207 = vmatprep.mubr.msk.bf16.mxu0 %vm303_vm0, %v302_v0  ;;  %v220_v3 = vld [vmem:[#allocation5 + $0x10] sm:$0xff]   ;;  %v221_v4 = vld [vmem:[#allocation5 + $0x18] sm:$0xff]   ;;  %v222_v5 = vld [vmem:[#allocation5 + $0x20] sm:$0xff]   ;;  %s304_s11 = smov [#allocation7]  }
  0x28   :  { %192 = vmatpush3.bf16.msra.mxu0 %v218_v1  ;;  %v223_v6 = vld [vmem:[#allocation5 + $0x28] sm:$0xff]   ;;  %v224_v7 = vld [vmem:[#allocation5 + $0x30] sm:$0xff]   ;;  %v225_v8 = vld [vmem:[#allocation5 + $0x38] sm:$0xff]   ;;  %s163_s12 = sshll.u32 %s304_s11, 4  ;;  %s164_s12 = int_to_ptr.vmem [resolvable:$true] %s163_s12 }
  0x29   :  { %193 = vmatprep.subr.bf16.mxu0 %v302_v0  ;;  %v42_v9 = vld [vmem:[#allocation2] sm:$0xff]  ;;  %s270_s13 = scalar_lea.vmem %s164_s12, 64  ;;  %p275_p3 = scmp.lt.s32.totalorder %s164_s12, %s164_s12 }
  0x2a   :  { %v43_v10 = vpack.c.bf16 %v42_v9, %v42_v9  ;;  %v173_v11 = vld [vmem:[%s373_s2] ss:$0 sm:$0xff]  ;;  %p271_p2 = scmp.ne.s32.totalorder %s164_s12, %s270_s13  ;;  %p276_p4 = scmp.lt.s32.totalorder %s270_s13, %s270_s13 }
  0x2c   :  { %194 = vmatpush3.bf16.msra.mxu0 %v219_v2  ;;  %p277_p5 = por %p276_p4, %p275_p3 }
  0x2d   :  { %195 = vmatprep.subr.bf16.mxu0 %v302_v0 }
  0x2e   :  { %p278_p6 = pnand %p277_p5, %p271_p2 }
  0x30   :  { %196 = vmatpush3.bf16.msra.mxu0 %v220_v3 }
  0x31   :  { %197 = vmatprep.subr.bf16.mxu0 %v302_v0 }
  0x34   :  { %198 = vmatpush3.bf16.msra.mxu0 %v221_v4 }
  0x35   :  { %199 = vmatprep.subr.bf16.mxu0 %v302_v0 }
  0x38   :  { %200 = vmatpush3.bf16.msra.mxu0 %v222_v5 }
  0x39   :  { %201 = vmatprep.subr.bf16.mxu0 %v302_v0 }
  0x3c   :  { %202 = vmatpush3.bf16.msra.mxu0 %v223_v6 }
  0x3d   :  { %203 = vmatprep.subr.bf16.mxu0 %v302_v0 }
  0x40   :  { %204 = vmatpush3.bf16.msra.mxu0 %v224_v7 }
  0x41   :  { %205 = vmatprep.subr.bf16.mxu0 %v302_v0 }
  0x44   :  { %206 = vmatpush3.bf16.msra.mxu0 %v225_v8 }
  0x47   :  { %208 = vmatmul.mubr.bf16.vlgmr.msra.gmra.mrb[0].mxu0 %v43_v10 }
 0x11a   :  { %v149_v12 = vpop.f32.mrb[0].mxu0 }
 0x11b   :  { %v150_v13 = vadd.f32 %v173_v11, %v149_v12  ;;  %v209_v14 = vpop.f32.mrb[1].mxu0 }
 0x11c   :  { %v152_v15 = vpop.f32.mrb[2].mxu0 }
 0x11d   :  { %v155_v16 = vpack.c.bf16 %v150_v13, %v150_v13  ;;  %v210_v17 = vpop.f32.mrb[3].mxu0 }
 0x11f   :  { %156 = vst [vmem:[#allocation7] sm:$0xf] %v155_v16 }
 0x120   :  { %281 = shalt.err (!%p278_p6)
}
 0x121   :  { %s282_s2 = scalar_lea.hbm %s374_s3, 64 }
 0x122   :  { %p283_p7 = scmp.ne.s32.totalorder %s374_s3, %s282_s2  ;;  %p286_p8 = scmp.lt.u32.totalorder %s282_s2, %s374_s3 }
 0x124   :  { %p288_p9 = pnand %p286_p8, %p283_p7 }
 0x126   :  { %291 = shalt.err (!%p288_p9)
}
 0x127   :  { %166 = dma.vmem_to_hbm [thread:$0]  %s164_s12, 64, %s374_s3, [#allocation4]  }
 0x128   :  { %296 = dma.done.wait [#allocation4], 64  }
 0x129   :  { %297 = vsyncadd [#allocation4], 4294967232 }
 0x12a   :  { %170 = vsyncpa [#allocation3], 1 }
 0x12b   :  { %171 = vsyncpa [#allocation6], 1 }
 0x12c   :  { %172 = vsyncpa [#allocation4], 1 }

</bundles_post_ra>
